<compile_context>
chip_gen: v7x
topology: tpu7x:2x2x1
jax: 0.10.0
libtpu: 0.0.40
codegen_flags: <defaults>
</compile_context>

<pallas_src>
import functools

import jax
import jax.numpy as jnp
from jax import lax
from jax.experimental import pallas as pl
from jax.experimental.pallas import tpu as pltpu


def _resblock_kernel(x_ref, bn_ref, w_ref, o_ref, *, B, C, L, K, P):
    """ResBlock forward for a tile of B samples in (B, C, L) layout.

    x_ref  : (B, C, L) f32    input tile (channels = sublanes, length = lanes)
    bn_ref : (4, C, 1) f32    folded BN params, rows = [s1, b1, s2, b2]
    w_ref  : (2, C, K*C) bf16 conv weights, W2d[o, t*C + i] = W_torch[o, i, t]
    o_ref  : (B, C, L) f32    output tile
    """
    s1 = bn_ref[0]            # (C, 1) -- broadcasts along lanes
    b1 = bn_ref[1]
    s2 = bn_ref[2]
    b2 = bn_ref[3]
    w1 = w_ref[0]             # (C, K*C) bf16
    w2 = w_ref[1]

    def conv_same(h_f32, w2d):
        # 'same' Conv1d as ONE fused MXU matmul.  im2col along the channel
        # (sublane) axis: the K shifted views are static lane slices of a
        # zero-halo copy held in vregs (no padded VMEM scratch, no full-buffer
        # zeroing -- only 2P halo lanes of zeros are materialized).
        h16 = h_f32.astype(jnp.bfloat16)                 # cast dot operand only
        halo = jnp.zeros((C, P), jnp.bfloat16)
        h_pad = jnp.concatenate([halo, h16, halo], axis=1)        # (C, L + 2P)
        z = jnp.concatenate([h_pad[:, t:t + L] for t in range(K)], axis=0)
        # (C_out, K*C) @ (K*C, L) -> (C_out, L), f32 accumulation on the MXU.
        return jnp.dot(w2d, z, preferred_element_type=jnp.float32)

    for b in range(B):                                   # static unroll, B small
        x = x_ref[b]                                     # (C, L) f32
        # bn1 -> relu -> dropout(identity in eval)   (f32 elementwise on VPU)
        h1 = jnp.maximum(x * s1 + b1, 0.0)
        c1 = conv_same(h1, w1)                           # conv1 (fused MXU dot)
        # bn2 -> relu -> dropout(identity in eval)
        h2 = jnp.maximum(c1 * s2 + b2, 0.0)
        c2 = conv_same(h2, w2)                           # conv2
        o_ref[b] = (c2 + x).astype(o_ref.dtype)          # residual add


def _pick_batch_tile(n):
    # Keep at least 2 grid steps when possible (feeds both v7x TensorCores /
    # megacore halves), but grow the tile with N (cap 8) to amortize the
    # per-grid-step pipeline overhead.
    return max(1, min(8, pl.cdiv(n, 2)))


def resblock_forward(x_ncl, params, *, kernel_size, padding, batch_tile=None):
    """x_ncl: (N, C, L) float32, PyTorch layout.  Returns (N, C, L) float32."""
    N, C, L = x_ncl.shape
    K, P = kernel_size, padding
    assert 2 * P == K - 1, "residual add requires 'same' conv (stride=1)"

    eps = 1e-5
    # Fold BatchNorm1d (eval mode) into per-channel scale / shift, pack into a
    # single grid-invariant (4, C, 1) operand.
    s1 = params["bn1_gamma"] / jnp.sqrt(params["bn1_var"] + eps)
    b1 = params["bn1_beta"] - params["bn1_mean"] * s1
    s2 = params["bn2_gamma"] / jnp.sqrt(params["bn2_var"] + eps)
    b2 = params["bn2_beta"] - params["bn2_mean"] * s2
    bn = jnp.stack([s1, b1, s2, b2], axis=0).reshape(4, C, 1).astype(jnp.float32)

    # PyTorch conv weight (C_out, C_in, K) -> flattened (C_out, K*C_in) with
    # column index t*C_in + i, pre-cast to bf16 (MXU-native input dtype).
    def flat_w(w):
        return jnp.transpose(w, (0, 2, 1)).reshape(C, K * C).astype(jnp.bfloat16)

    w = jnp.stack([flat_w(params["conv1_w"]), flat_w(params["conv2_w"])], axis=0)

    bt = batch_tile if batch_tile is not None else _pick_batch_tile(N)
    n_pad = pl.cdiv(N, bt) * bt
    x_in = x_ncl if n_pad == N else jnp.pad(
        x_ncl, ((0, n_pad - N), (0, 0), (0, 0)))

    kernel = functools.partial(_resblock_kernel, B=bt, C=C, L=L, K=K, P=P)

    out = pl.pallas_call(
        kernel,
        out_shape=jax.ShapeDtypeStruct((n_pad, C, L), jnp.float32),
        grid_spec=pltpu.PrefetchScalarGridSpec(
            num_scalar_prefetch=0,
            grid=(n_pad // bt,),
            in_specs=[
                pl.BlockSpec((bt, C, L), lambda n: (n, 0, 0)),      # x (NCL)
                pl.BlockSpec((4, C, 1), lambda n: (0, 0, 0)),       # packed BN
                pl.BlockSpec((2, C, K * C), lambda n: (0, 0, 0)),   # packed W
            ],
            out_specs=pl.BlockSpec((bt, C, L), lambda n: (n, 0, 0)),
        ),
        compiler_params=pltpu.CompilerParams(
            dimension_semantics=("parallel",)),
    )(x_in, bn, w)

    return out[:N] if n_pad != N else out


def resblock_reference(x_ncl, params, *, kernel_size, padding,
                       matmul_dtype=jnp.float32):
    """Plain-JAX reference (eval-mode BN, dropout=identity, downsample=None).

    matmul_dtype=jnp.bfloat16 mirrors the kernel's bf16 MXU inputs exactly
    (f32 accumulation), giving a tight numerical check.
    """
    eps = 1e-5
    P = padding

    def bn(x, g, b, m, v):
        s = g / jnp.sqrt(v + eps)
        return x * s[None, :, None] + (b - m * s)[None, :, None]

    def conv(x, wgt):
        return lax.conv_general_dilated(
            x.astype(matmul_dtype), wgt.astype(matmul_dtype),
            window_strides=(1,), padding=[(P, P)],
            dimension_numbers=("NCH", "OIH", "NCH"),
            preferred_element_type=jnp.float32)

    h = jnp.maximum(bn(x_ncl, params["bn1_gamma"], params["bn1_beta"],
                       params["bn1_mean"], params["bn1_var"]), 0.0)
    h = conv(h, params["conv1_w"])
    h = jnp.maximum(bn(h, params["bn2_gamma"], params["bn2_beta"],
                       params["bn2_mean"], params["bn2_var"]), 0.0)
    h = conv(h, params["conv2_w"])
    return h + x_ncl


if __name__ == "__main__":
    # Small shapes consistent with the module (downsample=None requires
    # in_channels == out_channels, stride=1, padding=(kernel_size-1)//2).
    N, C, L = 2, 4, 16
    K, P = 3, 1

    key = jax.random.PRNGKey(0)
    keys = jax.random.split(key, 8)

    params = {
        "bn1_gamma": 1.0 + 0.1 * jax.random.normal(keys[0], (C,), jnp.float32),
        "bn1_beta": 0.1 * jax.random.normal(keys[1], (C,), jnp.float32),
        "bn1_mean": 0.1 * jax.random.normal(keys[2], (C,), jnp.float32),
        "bn1_var": 0.5 + jax.random.uniform(keys[3], (C,), jnp.float32),
        "bn2_gamma": 1.0 + 0.1 * jax.random.normal(keys[4], (C,), jnp.float32),
        "bn2_beta": 0.1 * jax.random.normal(keys[5], (C,), jnp.float32),
        "bn2_mean": jnp.zeros((C,), jnp.float32),
        "bn2_var": jnp.ones((C,), jnp.float32),
        "conv1_w": 0.3 * jax.random.normal(keys[6], (C, C, K), jnp.float32),
        "conv2_w": 0.3 * jax.random.normal(keys[7], (C, C, K), jnp.float32),
    }

    x = jax.random.normal(key, (N, C, L), jnp.float32)

    out = jax.block_until_ready(
        resblock_forward(x, params, kernel_size=K, padding=P))
    assert out.shape == (N, C, L)

    # Tight check against a reference with identically bf16-quantized matmul
    # inputs (f32 accumulation) -- isolates kernel logic from bf16 rounding.
    ref_bf16 = resblock_reference(x, params, kernel_size=K, padding=P,
                                  matmul_dtype=jnp.bfloat16)
    assert jnp.allclose(out, ref_bf16, atol=5e-3, rtol=5e-3), \
        "mismatch vs bf16-matched reference"

    # Looser sanity check against the pure-f32 PyTorch-equivalent reference
    # (difference is only bf16 quantization of the MXU inputs).
    ref_f32 = resblock_reference(x, params, kernel_size=K, padding=P)
    assert jnp.allclose(out, ref_f32, atol=5e-2, rtol=5e-2), \
        "mismatch vs f32 reference"

    # TODO(synk): training-mode Dropout / BatchNorm batch-stats and the
    # optional downsample/maxpool branch are not exercised (eval, downsample=None).
    print("KERNEL_OK")
</pallas_src>

<mosaic_0001>
module attributes {stable_mosaic.version = 11 : i64} {
  func.func @_resblock_kernel(%arg0: i32, %arg1: memref<1x4x16xf32, #tpu.memory_space<vmem>>, %arg2: memref<4x4x1xf32, #tpu.memory_space<vmem>>, %arg3: memref<2x4x12xbf16, #tpu.memory_space<vmem>>, %arg4: memref<1x4x16xf32, #tpu.memory_space<vmem>>) attributes {dimension_semantics = [#tpu.dimension_semantics<parallel>], iteration_bounds = array<i64: 2>, scalar_prefetch = 0 : i64, scratch_operands = 0 : i64, tpu.core_type = #tpu.core_type<tc>, window_params = [{transform_indices = @transform_0, window_bounds = array<i64: 1, 4, 16>}, {pipeline_mode = #tpu.pipeline_mode<synchronous>, transform_indices = @transform_1, window_bounds = array<i64: 4, 4, 1>}, {pipeline_mode = #tpu.pipeline_mode<synchronous>, transform_indices = @transform_2, window_bounds = array<i64: 2, 4, 12>}, {transform_indices = @transform_3, window_bounds = array<i64: 1, 4, 16>}]} {
    %c0 = arith.constant 0 : index
    %c0_0 = arith.constant 0 : index
    %c0_1 = arith.constant 0 : index
    %0 = vector.load %arg2[%c0, %c0_0, %c0_1] : memref<4x4x1xf32, #tpu.memory_space<vmem>>, vector<1x4x1xf32>
    %1 = vector.shape_cast %0 : vector<1x4x1xf32> to vector<4x1xf32>
    %c1 = arith.constant 1 : index
    %c0_2 = arith.constant 0 : index
    %c0_3 = arith.constant 0 : index
    %2 = vector.load %arg2[%c1, %c0_2, %c0_3] : memref<4x4x1xf32, #tpu.memory_space<vmem>>, vector<1x4x1xf32>
    %3 = vector.shape_cast %2 : vector<1x4x1xf32> to vector<4x1xf32>
    %c2 = arith.constant 2 : index
    %c0_4 = arith.constant 0 : index
    %c0_5 = arith.constant 0 : index
    %4 = vector.load %arg2[%c2, %c0_4, %c0_5] : memref<4x4x1xf32, #tpu.memory_space<vmem>>, vector<1x4x1xf32>
    %5 = vector.shape_cast %4 : vector<1x4x1xf32> to vector<4x1xf32>
    %c3 = arith.constant 3 : index
    %c0_6 = arith.constant 0 : index
    %c0_7 = arith.constant 0 : index
    %6 = vector.load %arg2[%c3, %c0_6, %c0_7] : memref<4x4x1xf32, #tpu.memory_space<vmem>>, vector<1x4x1xf32>
    %7 = vector.shape_cast %6 : vector<1x4x1xf32> to vector<4x1xf32>
    %c0_8 = arith.constant 0 : index
    %c0_9 = arith.constant 0 : index
    %c0_10 = arith.constant 0 : index
    %8 = vector.load %arg3[%c0_8, %c0_9, %c0_10] : memref<2x4x12xbf16, #tpu.memory_space<vmem>>, vector<1x4x12xbf16>
    %9 = vector.shape_cast %8 : vector<1x4x12xbf16> to vector<4x12xbf16>
    %c1_11 = arith.constant 1 : index
    %c0_12 = arith.constant 0 : index
    %c0_13 = arith.constant 0 : index
    %10 = vector.load %arg3[%c1_11, %c0_12, %c0_13] : memref<2x4x12xbf16, #tpu.memory_space<vmem>>, vector<1x4x12xbf16>
    %11 = vector.shape_cast %10 : vector<1x4x12xbf16> to vector<4x12xbf16>
    %c0_14 = arith.constant 0 : index
    %c0_15 = arith.constant 0 : index
    %c0_16 = arith.constant 0 : index
    %12 = vector.load %arg1[%c0_14, %c0_15, %c0_16] : memref<1x4x16xf32, #tpu.memory_space<vmem>>, vector<1x4x16xf32>
    %13 = vector.shape_cast %12 : vector<1x4x16xf32> to vector<4x16xf32>
    %14 = vector.broadcast %1 : vector<4x1xf32> to vector<4x16xf32>
    %15 = arith.mulf %13, %14 : vector<4x16xf32>
    %16 = vector.broadcast %3 : vector<4x1xf32> to vector<4x16xf32>
    %17 = arith.addf %15, %16 : vector<4x16xf32>
    %cst = arith.constant 0.000000e+00 : f32
    %18 = vector.broadcast %cst : f32 to vector<4x16xf32>
    %19 = arith.maximumf %17, %18 : vector<4x16xf32>
    %20 = arith.truncf %19 : vector<4x16xf32> to vector<4x16xbf16>
    %cst_17 = arith.constant 0.000000e+00 : bf16
    %21 = vector.broadcast %cst_17 : bf16 to vector<4x1xbf16>
    %22 = tpu.concatenate %21, %20, %21 in 1 : vector<4x1xbf16>, vector<4x16xbf16>, vector<4x1xbf16> -> vector<4x18xbf16>
    %23 = vector.extract_strided_slice %22 {offsets = [0, 0], sizes = [4, 16], strides = [1, 1]} : vector<4x18xbf16> to vector<4x16xbf16>
    %24 = vector.extract_strided_slice %22 {offsets = [0, 1], sizes = [4, 16], strides = [1, 1]} : vector<4x18xbf16> to vector<4x16xbf16>
    %25 = vector.extract_strided_slice %22 {offsets = [0, 2], sizes = [4, 16], strides = [1, 1]} : vector<4x18xbf16> to vector<4x16xbf16>
    %26 = tpu.concatenate %23, %24, %25 in 0 : vector<4x16xbf16>, vector<4x16xbf16>, vector<4x16xbf16> -> vector<12x16xbf16>
    %cst_18 = arith.constant dense<0.000000e+00> : vector<4x16xf32>
    %27 = tpu.matmul %9, %26, %cst_18 {dimension_numbers = #tpu.dot_dimension_numbers<[1], [0], [0], [1], [0, 0, 1, 1], [], []>} : vector<4x12xbf16>, vector<12x16xbf16>, vector<4x16xf32> -> vector<4x16xf32>
    %28 = vector.broadcast %5 : vector<4x1xf32> to vector<4x16xf32>
    %29 = arith.mulf %27, %28 : vector<4x16xf32>
    %30 = vector.broadcast %7 : vector<4x1xf32> to vector<4x16xf32>
    %31 = arith.addf %29, %30 : vector<4x16xf32>
    %cst_19 = arith.constant 0.000000e+00 : f32
    %32 = vector.broadcast %cst_19 : f32 to vector<4x16xf32>
    %33 = arith.maximumf %31, %32 : vector<4x16xf32>
    %34 = arith.truncf %33 : vector<4x16xf32> to vector<4x16xbf16>
    %cst_20 = arith.constant 0.000000e+00 : bf16
    %35 = vector.broadcast %cst_20 : bf16 to vector<4x1xbf16>
    %36 = tpu.concatenate %35, %34, %35 in 1 : vector<4x1xbf16>, vector<4x16xbf16>, vector<4x1xbf16> -> vector<4x18xbf16>
    %37 = vector.extract_strided_slice %36 {offsets = [0, 0], sizes = [4, 16], strides = [1, 1]} : vector<4x18xbf16> to vector<4x16xbf16>
    %38 = vector.extract_strided_slice %36 {offsets = [0, 1], sizes = [4, 16], strides = [1, 1]} : vector<4x18xbf16> to vector<4x16xbf16>
    %39 = vector.extract_strided_slice %36 {offsets = [0, 2], sizes = [4, 16], strides = [1, 1]} : vector<4x18xbf16> to vector<4x16xbf16>
    %40 = tpu.concatenate %37, %38, %39 in 0 : vector<4x16xbf16>, vector<4x16xbf16>, vector<4x16xbf16> -> vector<12x16xbf16>
    %cst_21 = arith.constant dense<0.000000e+00> : vector<4x16xf32>
    %41 = tpu.matmul %11, %40, %cst_21 {dimension_numbers = #tpu.dot_dimension_numbers<[1], [0], [0], [1], [0, 0, 1, 1], [], []>} : vector<4x12xbf16>, vector<12x16xbf16>, vector<4x16xf32> -> vector<4x16xf32>
    %42 = arith.addf %41, %13 : vector<4x16xf32>
    %c0_22 = arith.constant 0 : index
    %c0_23 = arith.constant 0 : index
    %c0_24 = arith.constant 0 : index
    %43 = vector.load %arg4[%c0_22, %c0_23, %c0_24] : memref<1x4x16xf32, #tpu.memory_space<vmem>>, vector<1x4x16xf32>
    %44 = vector.shape_cast %43 : vector<1x4x16xf32> to vector<4x16xf32>
    %45 = vector.shape_cast %42 : vector<4x16xf32> to vector<1x4x16xf32>
    tpu.vector_store %arg4[%c0_22, %c0_23, %c0_24], %45 {strides = array<i32>} : memref<1x4x16xf32, #tpu.memory_space<vmem>>, vector<1x4x16xf32>,
    return
  }
  func.func @transform_0(%arg0: i32) -> (i32, i32, i32) {
    %c0_i32 = arith.constant 0 : i32
    %c0_i32_0 = arith.constant 0 : i32
    %c0_i32_1 = arith.constant 0 : i32
    return %arg0, %c0_i32, %c0_i32_0 : i32, i32, i32
  }
  func.func @transform_1(%arg0: i32) -> (i32, i32, i32) {
    %c0_i32 = arith.constant 0 : i32
    %c0_i32_0 = arith.constant 0 : i32
    %c0_i32_1 = arith.constant 0 : i32
    %c0_i32_2 = arith.constant 0 : i32
    return %c0_i32, %c0_i32_0, %c0_i32_1 : i32, i32, i32
  }
  func.func @transform_2(%arg0: i32) -> (i32, i32, i32) {
    %c0_i32 = arith.constant 0 : i32
    %c0_i32_0 = arith.constant 0 : i32
    %c0_i32_1 = arith.constant 0 : i32
    %c0_i32_2 = arith.constant 0 : i32
    return %c0_i32, %c0_i32_0, %c0_i32_1 : i32, i32, i32
  }
  func.func @transform_3(%arg0: i32) -> (i32, i32, i32) {
    %c0_i32 = arith.constant 0 : i32
    %c0_i32_0 = arith.constant 0 : i32
    %c0_i32_1 = arith.constant 0 : i32
    return %arg0, %c0_i32, %c0_i32_0 : i32, i32, i32
  }
}

</mosaic_0001>

<bundles_post_ra>
// kernel: tpu_custom_call.1
= control target key start
LH: loop header
LB: loop body
LE: loop exit
PB: predicated region body
PF: predicated region fallthrough
CT: control target
= control target key end

     0   :  { %8 = vsyncpa [#allocation3], 0  ;;  %s722_s0 = inlined_call_operand.vmem [shape: f32[2,4,16], index: 0, kind: input, shape index: {}]   ;;  %s723_s1 = inlined_call_operand.vmem [shape: f32[4,4,1], index: 1, kind: input, shape index: {}]   ;;  %s724_s2 = inlined_call_operand.vmem [shape: bf16[2,4,12], index: 2, kind: input, shape index: {}]   ;;  %s725_s3 = inlined_call_operand.hbm [shape: f32[2,4,16], index: 3, kind: output, shape index: {}]  }
   0x1   :  { %10 = vsyncpa [#allocation3 + $0x1], 0  ;;  %s582_s12 = smov 0   ;;  %s584_s13 = smov 0  }
   0x2   :  { %s586_s14 = smov 0   ;;  %s588_s15 = smov 0  }
   0x3 LB: > { %s603_s16 = sadd.s32 4294967295, %s553_s15   ;;  %s412_s17 = sadd.s32 4294967294, %s553_s15   ;;  %s553_s15 = sphi %s588_s15, %s731_s15   ;;  %s549_s14 = sphi %s586_s14, %s730_s14   ;;  %s545_s13 = sphi %s584_s13, %s729_s13   ;;  %s541_s12 = sphi %s582_s12, %s728_s12  }
   0x4   : > { %s607_s18 = sadd.s32 1, %s553_s15   ;;  %s91_s19 = sadd.s32 1, %s549_s14 }
   0x5   : > { %s88_s20 = ssub.s32 %s553_s15, %s607_s18  ;;  %p101_p0 = scmp.ne.s32.totalorder %s549_s14, %s545_s13 }
   0x6   : > { %p89_p1 = scmp.eq.s32.totalorder %s88_s20, 0  ;;  %p102_p2 = scmp.eq.s32.totalorder %s603_s16, 1 }
   0x7   : > { %p107_p3 = scmp.ne.s32.totalorder %s545_s13, %s541_s12  ;;  %p108_p4 = scmp.eq.s32.totalorder %s412_s17, 1 }
   0x8   : > { %s618_s21 = scalar_select %p89_p1, %s549_s14, %s91_s19  }
   0x9   : > { %p620_p5 = por %p102_p2, %p101_p0  ;;  %p624_p6 = por %p108_p4, %p107_p3 }
   0xa   : > { %p415_p7 = scmp.ge.s32.totalorder %s553_s15, 1  ;;  %p139_p8 = scmp.lt.s32.totalorder %s553_s15, 3 }
   0xc   : > { %p140_p9 = pnand %p415_p7, %p139_p8 }
   0xd   : > { %v167_v0 = vld [vmem:[%s723_s1] sm:$0xf] (!%p140_p9)  ;;  %v555_v1 = vmov (!%p140_p9), 0   ;;  %v418_v2 = vld [vmem:[%s723_s1 + $0x4] sm:$0xf] (!%p140_p9)  ;;  %p162_p10 = scmp.lt.s32.totalorder (!%p140_p9), %s603_s16, 1 }
   0xe   : > { %143 = sbr.rel (%p140_p9) target bundleno = 1081 (0x439), region = 32  ;;  %489 = vset.pattern.permute.xlu0 (!%p140_p9), %v555_v1  ;;  %490 = vset.pattern.permute.xlu1 (!%p140_p9), %v555_v1  ;;  %s556_s6 = smov (!%p140_p9), 1   ;;  %v557_v10 = vmov (!%p140_p9), 0.0   ;;  %vm558_vm0 = vmmov (!%p140_p9), 0   ;;  %vm195_vm1 = vcmask (!%p140_p9), 7168   ;;  %vm199_vm2 = vcmask (!%p140_p9), 138240  }
   0xf   : > { %180 = vperm.xlu0 (!%p140_p9), %489, %v167_v0   ;;  %432 = vmatprep.subr.bf16.mxu0 (!%p140_p9), %v557_v10  ;;  %s559_s7 = smov (!%p140_p9), 126   ;;  %s560_s8 = smov (!%p140_p9), 127   ;;  %v420_v16 = vld [vmem:[%s723_s1 + $0xc] sm:$0xf] (!%p140_p9)  ;;  %v419_v17 = vld [vmem:[%s723_s1 + $0x8] sm:$0xf] (!%p140_p9) }
  0x10   : > { %438 = vmatprep.subr.bf16.mxu1 (!%p140_p9), %v557_v10  ;;  %434 = vmatprep.mubr.msk.bf16.mxu0 (!%p140_p9), %vm558_vm0, %v557_v10  ;;  %vm208_vm3 = vcmask (!%p140_p9), 1041408   ;;  %vm211_vm4 = vcmask (!%p140_p9), 1043456   ;;  %vm218_vm5 = vcmask (!%p140_p9), 1045504   ;;  %v174_v23 = vld [vmem:[%s724_s2] sm:$0x3] (!%p140_p9)  ;;  %vm214_vm6 = vcmask (!%p140_p9), 97280  }
  0x11   : > { %440 = vmatprep.mubr.msk.bf16.mxu1 (!%p140_p9), %vm558_vm0, %v557_v10  ;;  %v421_v44 = vld [vmem:[%s724_s2 + $0x2] sm:$0x3] (!%p140_p9)  ;;  %s159_s26 = sand.u32 (!%p140_p9), 1, %s545_s13   ;;  %vm337_vm7 = vcmask (!%p140_p9), 125952  }
  0x12   : > { %s416_s27 = sshll.u32 (!%p140_p9), %s159_s26, 2 }
  0x13   : > { %186 = vperm.xlu0 (!%p140_p9), %489, %v418_v2  }
  0x15   : > { %s163_s28 = scalar_select %p162_p10, %s603_s16, 1 }
  0x17   : > { %s417_s29 = sshll.u32 %s163_s28, 2  ;;  %s425_s28 = sshll.u32 %s603_s16, 6 }
  0x18   : > { %s165_s5 = scalar_lea.vmem %s722_s0, %s417_s29  ;;  %s161_s29 = scalar_lea.vmem [#allocation2], %s416_s27 }
  0x19   : > { %v641_v4 = vld [vmem:[%s165_s5] sm:$0xf]  ;;  %s353_s30 = sshll.u32 %s161_s29, 4  ;;  %s340_s16 = scalar_lea.sflag [#allocation3], %s159_s26  ;;  %s682_s30 = int_to_ptr.vmem [resolvable:$true] %s353_s30 }
  0x8e   : > { %v181_v3 = vpop.permute.xlu0 %180 }
  0x8f   : > { %v183_v5 = vmul.f32 %v181_v3, %v641_v4 }
  0x92   : > { %v187_v6 = vpop.permute.xlu0 %186 }
  0x93   : > { %v189_v7 = vadd.f32 %v187_v6, %v183_v5 }
  0x95   : > { %v190_v8 = vmax.f32 %v189_v7, 0.0 }
  0x97   : > { %v191_v9 = vpack.c.bf16 %v190_v8, %v190_v8 }
  0x99   : > { %193 = vrot.lane.b32.xlu1 %v191_v9, %s556_s6 }
 0x10b   : > { %v194_v11 = vpop.permute.xlu1 %193 }
 0x10c   : > { %v198_v12 = vsel %vm195_vm1, 0, %v194_v11 }
 0x10d   : > { %v200_v13 = vsel %vm199_vm2, %v198_v12, 0 }
 0x10e   : > { %v202_v14 = vrot.slane %v200_v13, 6  ;;  %v205_v15 = vrot.slane %v200_v13, 4 }
 0x110   : > { %206 = vrot.lane.b32.xlu0 %v205_v15, %s559_s7  ;;  %203 = vrot.lane.b32.xlu1 %v202_v14, %s560_s8 }
 0x114   : > { %269 = vperm.xlu0 %489, %v420_v16   ;;  %263 = vperm.xlu1 %490, %v419_v17  }
 0x182   : > { %v207_v18 = vpop.permute.xlu0 %206  ;;  %v204_v19 = vpop.permute.xlu1 %203 }
 0x183   : > { %v210_v20 = vsel %vm208_vm3, %v200_v13, %v204_v19 }
 0x184   : > { %v213_v21 = vsel %vm211_vm4, %v210_v20, %v207_v18 }
 0x185   : > { %v219_v22 = vsel %vm218_vm5, %v213_v21, 0 }
 0x186   : > { %433 = vmatpush3.bf16.msra.mxu0 %v219_v22 }
 0x189   : > { %435 = vmatmul.mubr.msk.bf16.vlgmr.msra.gmra.mrb[0].mxu0 %vm214_vm6, %v174_v23 }
 0x193   : > { %v264_v24 = vpop.permute.xlu1 %263  ;;  %v270_v28 = vpop.permute.xlu0 %269 }
 0x25c   : > { %v255_v25 = vpop.f32.mrb[0].mxu0 }
 0x25d   : > { %v266_v26 = vmul.f32 %v264_v24, %v255_v25  ;;  %v436_v27 = vpop.f32.mrb[1].mxu0 }
 0x25e   : > { %v258_v29 = vpop.f32.mrb[2].mxu0 }
 0x25f   : > { %v272_v30 = vadd.f32 %v270_v28, %v266_v26  ;;  %v437_v31 = vpop.f32.mrb[3].mxu0 }
 0x261   : > { %v273_v32 = vmax.f32 %v272_v30, 0.0 }
 0x263   : > { %v274_v33 = vpack.c.bf16 %v273_v32, %v273_v32 }
 0x265   : > { %276 = vrot.lane.b32.xlu1 %v274_v33, %s556_s6  ;;  %s680_s6 = scalar_lea.hbm %s725_s3, %s425_s28 }
 0x2d7   : > { %v277_v34 = vpop.permute.xlu1 %276 }
 0x2d8   : > { %v279_v35 = vsel %vm195_vm1, 0, %v277_v34 }
 0x2d9   : > { %v280_v36 = vsel %vm199_vm2, %v279_v35, 0 }
 0x2da   : > { %v282_v37 = vrot.slane %v280_v36, 6  ;;  %v285_v38 = vrot.slane %v280_v36, 4 }
 0x2dc   : > { %286 = vrot.lane.b32.xlu1 %v285_v38, %s559_s7  ;;  %283 = vrot.lane.b32.xlu0 %v282_v37, %s560_s8  ;;  %s491_s7 = scalar_lea.vmem %s682_s30, 64  ;;  %s561_s8 = smov [#allocation2]  }
 0x2dd   : > { %p492_p11 = scmp.ne.s32.totalorder %s682_s30, %s491_s7  ;;  %s495_s9 = sshll.u32 %s561_s8, 4  ;;  %s496_s9 = int_to_ptr.vmem [resolvable:$false] %s495_s9 }
 0x2de   : > { %s497_s10 = scalar_lea.vmem %s496_s9, 128  ;;  %p498_p0 = scmp.lt.s32.totalorder %s682_s30, %s496_s9 }
 0x2df   : > { %p493_p12 = pnand %p492_p11, %p620_p5  ;;  %p499_p1 = scmp.lt.s32.totalorder %s497_s10, %s491_s7 }
 0x2e1   : > { %p494_p13 = pneg %p493_p12  ;;  %p500_p2 = por %p499_p1, %p498_p0 }
 0x2e3   : > { %p501_p3 = pnand %p500_p2, %p494_p13 }
 0x34e   : > { %v287_v39 = vpop.permute.xlu1 %286  ;;  %v284_v40 = vpop.permute.xlu0 %283 }
 0x34f   : > { %v289_v41 = vsel %vm208_vm3, %v280_v36, %v284_v40 }
 0x350   : > { %v291_v42 = vsel %vm211_vm4, %v289_v41, %v287_v39 }
 0x351   : > { %v295_v43 = vsel %vm218_vm5, %v291_v42, 0 }
 0x352   : > { %439 = vmatpush3.bf16.msra.mxu1 %v295_v43 }
 0x355   : > { %441 = vmatmul.mubr.msk.bf16.vlgmr.msra.gmra.mrb[0].mxu1 %vm214_vm6, %v421_v44 }
 0x428   : > { %v331_v45 = vpop.f32.mrb[0].mxu1 }
 0x429   : > { %v332_v46 = vadd.f32 %v331_v45, %v641_v4  ;;  %v442_v47 = vpop.f32.mrb[1].mxu1 }
 0x42a   : > { %v334_v48 = vpop.f32.mrb[2].mxu1 }
 0x42b   : > { %v443_v49 = vpop.f32.mrb[3].mxu1  ;;  %338 = vst.msk [vmem:[%s161_s29] sm:$0xf] %vm337_vm7, %v332_v46 }
 0x42c   : > { %504 = shalt.err (!%p501_p3)
}
 0x42d   : > { %s505_s11 = scalar_lea.hbm %s680_s6, 64  ;;  %s509_s20 = scalar_lea.hbm %s725_s3, 128 }
 0x42e   : > { %p506_p4 = scmp.ne.s32.totalorder %s680_s6, %s505_s11  ;;  %p510_p9 = scmp.lt.u32.totalorder %s680_s6, %s725_s3 }
 0x42f   : > { %p511_p10 = scmp.lt.u32.totalorder %s509_s20, %s505_s11  ;;  %p513_p12 = scmp.lt.u32.totalorder %s505_s11, %s680_s6 }
 0x430   : > { %p507_p7 = pnand %p506_p4, %p620_p5 }
 0x431   : > { %p512_p11 = por %p511_p10, %p510_p9 }
 0x432   : > { %p508_p8 = pneg %p507_p7 }
 0x433   : > { %p514_p13 = por %p513_p12, %p512_p11 }
 0x435   : > { %p515_p0 = pnand %p514_p13, %p508_p8 }
 0x437   : > { %518 = shalt.err (!%p515_p0)
}
 0x438   : > { %444 = dma.vmem_to_hbm [thread:$0]  (%p620_p5), %s682_s30, 64, %s680_s6, %s340_s16  }
 0x439 PF: > { %p450_p1 = scmp.ge.s32.totalorder %s553_s15, 2  ;;  %s365_s26 = sand.u32 1, %s541_s12  }
 0x43a   : > { %s366_s27 = scalar_lea.sflag [#allocation3], %s365_s26 }
 0x43b   : > { %p447_p2 = pnand %p450_p1, %p624_p6 }
 0x43d   : > { %536 = dma.done.wait (!%p447_p2), %s366_s27, 64  }
 0x43e   : > { %538 = vsyncadd (!%p447_p2), %s366_s27, 4294967232  ;;  %p13_p3 = scmp.ge.s32.totalorder %s607_s18, 4   ;;  %s728_s12 = smov %s545_s13 }
 0x43f   : > { %s729_s13 = smov %s549_s14  ;;  %s730_s14 = smov %s618_s21 }
 0x440   : > { %s731_s15 = smov %s607_s18  ;;  %15 = sbr.rel (!%p13_p3) target bundleno = 3 (0x3), region = 71 }
 0x447   :  { %371 = vsyncpa [#allocation3], 1 }
 0x448   :  { %373 = vsyncpa [#allocation3 + $0x1], 1 }

</bundles_post_ra>
